<compile_context>
chip_gen: v6e
topology: v6e:2x2x1
jax: 0.10.0
libtpu: 0.0.40
codegen_flags: <defaults>
</compile_context>

<pallas_src>
import jax
import jax.numpy as jnp
from jax.experimental import pallas as pl
from jax.experimental.pallas import tpu as pltpu


def _round_up(x, m):
    return ((x + m - 1) // m) * m


def _make_landmark_kernel(bt, precision):
    def kernel(x_ref, w_ref, b_ref, o_ref):
        # x_ref: (bt, Cin, T)   channel-major spatial tile, straight from NCHW
        # w_ref: (Cout, Cin)    squeezed 1x1 conv weight (activation dtype)
        # b_ref: (1, Cout)      f32 bias row (broadcasts over sublanes)
        # o_ref: (bt, T, Cout)  output tile, already in NHWC-flat layout
        w = w_ref[...]
        b = b_ref[...]
        for i in range(bt):  # bt is small & static -> unrolled, scheduler-visible
            acc = jnp.dot(w, x_ref[i], preferred_element_type=jnp.float32,
                          precision=precision)              # (Cout, T) on the MXU
            out = jnp.transpose(acc, (1, 0)) + b             # (T, Cout), XLU transpose
            o_ref[i] = out.astype(o_ref.dtype)
    return kernel


def _choose_tiling(B, HW, tile_hw, max_batch_block):
    """Pick (batch block, spatial tile) so per-step work is large and the grid
    keeps >= 2 steps along a parallel axis whenever the problem allows it."""
    tile_hw = max(128, (min(tile_hw, 16384) // 128) * 128)
    if HW > tile_hw:
        bt, tile = 1, tile_hw                       # spatial tiling, masked tail
    else:
        bt = max(1, min(B, tile_hw // max(HW, 1), max_batch_block))
        tile = HW                                   # full-extent spatial block
    n_b, n_hw = pl.cdiv(B, bt), pl.cdiv(HW, tile)
    if n_b * n_hw == 1:                             # keep both v7x TCs busy
        if B >= 2:
            bt = (B + 1) // 2
            n_b = pl.cdiv(B, bt)
        elif HW >= 256:
            tile = max(128, _round_up((HW + 1) // 2, 128))
            n_hw = pl.cdiv(HW, tile)
    return bt, tile, n_b, n_hw


def landmark_head_forward(x_nchw, weight, bias, *, num_anchors=2, tile_hw=8192,
                          max_batch_block=16, x_buffers=2,
                          precision=jax.lax.Precision.HIGHEST,
                          vmem_limit_bytes=48 * 1024 * 1024):
    """Equivalent of LandmarkHead.forward.

    x_nchw : (B, Cin, H, W)                      PyTorch NCHW feature map
    weight : (Cout, Cin) or (Cout, Cin, 1, 1)    1x1 conv weight, Cout = na*10
    bias   : (Cout,)
    returns: (B, H*W*num_anchors, 10)
    """
    B, Cin, H, W = x_nchw.shape
    if weight.ndim == 4:                           # raw conv weight (Cout, Cin, 1, 1)
        weight = weight.reshape(weight.shape[0], weight.shape[1])
    Cout = weight.shape[0]
    assert Cout == num_anchors * 10 and weight.shape[1] == Cin
    HW = H * W

    # Channel-major view of the input: a free reshape, no transpose.
    x_flat = x_nchw.reshape(B, Cin, HW)
    # Match the MXU operand dtype to the activations; keep bias in f32.
    w = weight.astype(x_nchw.dtype)
    b_row = bias.astype(jnp.float32).reshape(1, Cout)

    bt, tile, n_b, n_hw = _choose_tiling(B, HW, tile_hw, max_batch_block)
    grid = (n_b, n_hw)

    itemsize = jnp.dtype(x_nchw.dtype).itemsize
    cost = pl.CostEstimate(
        flops=2 * B * HW * Cin * Cout,
        transcendentals=0,
        bytes_accessed=int(B * Cin * HW * itemsize          # feature-map read
                           + Cout * Cin * itemsize + Cout * 4
                           + B * Cout * HW * itemsize),      # output write
    )

    x_spec_kwargs = {}
    if x_buffers != 2:
        x_spec_kwargs["pipeline_mode"] = pl.Buffered(x_buffers)

    out_hwc = pl.pallas_call(
        _make_landmark_kernel(bt, precision),
        out_shape=jax.ShapeDtypeStruct((B, HW, Cout), x_nchw.dtype),
        grid_spec=pltpu.PrefetchScalarGridSpec(
            num_scalar_prefetch=0,
            grid=grid,
            in_specs=[
                pl.BlockSpec((bt, Cin, tile), lambda b, j: (b, 0, j),
                             **x_spec_kwargs),
                pl.BlockSpec((Cout, Cin), lambda b, j: (0, 0)),
                pl.BlockSpec((1, Cout), lambda b, j: (0, 0)),
            ],
            out_specs=pl.BlockSpec((bt, tile, Cout), lambda b, j: (b, j, 0)),
        ),
        compiler_params=pltpu.CompilerParams(
            dimension_semantics=("parallel", "parallel"),
            vmem_limit_bytes=vmem_limit_bytes,
        ),
        cost_estimate=cost,
    )(x_flat, w, b_row)

    # (B, HW, na*10) -> (B, HW*na, 10) is contiguous: a free reshape matching
    # PyTorch's permute(0,2,3,1).contiguous().view(B, -1, 10) ordering
    # (channel c = anchor*10 + landmark).
    return out_hwc.reshape(B, HW * num_anchors, 10)


def _reference_forward(x_nchw, weight, bias, num_anchors=2):
    # Pure-JAX reference of the PyTorch semantics (1x1 conv == channel matmul).
    B, Cin, H, W = x_nchw.shape
    if weight.ndim == 4:
        weight = weight.reshape(weight.shape[0], weight.shape[1])
    out = jnp.einsum("bchw,oc->bohw",
                     x_nchw.astype(jnp.float32), weight.astype(jnp.float32),
                     precision=jax.lax.Precision.HIGHEST)
    out = out + bias.astype(jnp.float32)[None, :, None, None]
    out = jnp.transpose(out, (0, 2, 3, 1))
    return out.reshape(B, -1, 10)


if __name__ == "__main__":
    key = jax.random.PRNGKey(0)
    kx1, kx2, kx3, kw, kb = jax.random.split(key, 5)

    num_anchors = 2
    Cout = num_anchors * 10
    Cin = 32

    weight = jax.random.normal(kw, (Cout, Cin), dtype=jnp.float32) * 0.05
    bias = jax.random.normal(kb, (Cout,), dtype=jnp.float32) * 0.01

    # Case 1: small feature map -> batch-blocked path (several images/step);
    # B=3 with bt=2 also exercises the masked batch-tail block.
    x1 = jax.random.normal(kx1, (3, Cin, 8, 8), dtype=jnp.float32)
    out1 = jax.block_until_ready(
        landmark_head_forward(x1, weight, bias, num_anchors=num_anchors))
    ref1 = _reference_forward(x1, weight, bias, num_anchors=num_anchors)
    assert out1.shape == (3, 8 * 8 * num_anchors, 10), out1.shape
    assert jnp.allclose(out1, ref1, atol=1e-4, rtol=1e-4), float(
        jnp.max(jnp.abs(out1 - ref1)))

    # Case 2: spatial extent not divisible by the tile -> cdiv grid + masked
    # spatial tail block, multi-step parallel grid.
    x2 = jax.random.normal(kx2, (2, Cin, 20, 20), dtype=jnp.float32)
    out2 = jax.block_until_ready(
        landmark_head_forward(x2, weight, bias, num_anchors=num_anchors,
                              tile_hw=128))
    ref2 = _reference_forward(x2, weight, bias, num_anchors=num_anchors)
    assert out2.shape == (2, 20 * 20 * num_anchors, 10), out2.shape
    assert jnp.allclose(out2, ref2, atol=1e-4, rtol=1e-4), float(
        jnp.max(jnp.abs(out2 - ref2)))

    # Case 3: B=1 map that would otherwise be a single (1,1) grid step ->
    # spatial split so both v7x TensorCores get a block.
    x3 = jax.random.normal(kx3, (1, Cin, 16, 16), dtype=jnp.float32)
    out3 = jax.block_until_ready(
        landmark_head_forward(x3, weight, bias, num_anchors=num_anchors))
    ref3 = _reference_forward(x3, weight, bias, num_anchors=num_anchors)
    assert out3.shape == (1, 16 * 16 * num_anchors, 10), out3.shape
    assert jnp.allclose(out3, ref3, atol=1e-4, rtol=1e-4), float(
        jnp.max(jnp.abs(out3 - ref3)))

    print("KERNEL_OK")
</pallas_src>

<mosaic_0001>
module attributes {stable_mosaic.version = 11 : i64} {
  func.func @kernel(%arg0: i32, %arg1: i32, %arg2: memref<2x32x64xf32, #tpu.memory_space<vmem>>, %arg3: memref<20x32xf32, #tpu.memory_space<vmem>>, %arg4: memref<1x20xf32, #tpu.memory_space<vmem>>, %arg5: memref<2x64x20xf32, #tpu.memory_space<vmem>>) attributes {dimension_semantics = [#tpu.dimension_semantics<parallel>, #tpu.dimension_semantics<parallel>], iteration_bounds = array<i64: 2, 1>, scalar_prefetch = 0 : i64, scratch_operands = 0 : i64, tpu.core_type = #tpu.core_type<tc>, window_params = [{transform_indices = @transform_0, window_bounds = array<i64: 2, 32, 64>}, {pipeline_mode = #tpu.pipeline_mode<synchronous>, transform_indices = @transform_1, window_bounds = array<i64: 20, 32>}, {pipeline_mode = #tpu.pipeline_mode<synchronous>, transform_indices = @transform_2, window_bounds = array<i64: 1, 20>}, {transform_indices = @transform_3, window_bounds = array<i64: 2, 64, 20>}]} {
    %c0 = arith.constant 0 : index
    %c0_0 = arith.constant 0 : index
    %0 = vector.load %arg3[%c0, %c0_0] : memref<20x32xf32, #tpu.memory_space<vmem>>, vector<20x32xf32>
    %c0_1 = arith.constant 0 : index
    %c0_2 = arith.constant 0 : index
    %1 = vector.load %arg4[%c0_1, %c0_2] : memref<1x20xf32, #tpu.memory_space<vmem>>, vector<1x20xf32>
    %c0_3 = arith.constant 0 : index
    %c0_4 = arith.constant 0 : index
    %c0_5 = arith.constant 0 : index
    %2 = vector.load %arg2[%c0_3, %c0_4, %c0_5] : memref<2x32x64xf32, #tpu.memory_space<vmem>>, vector<1x32x64xf32>
    %3 = vector.shape_cast %2 : vector<1x32x64xf32> to vector<32x64xf32>
    %cst = arith.constant dense<0.000000e+00> : vector<20x64xf32>
    %4 = tpu.matmul %0, %3, %cst {dimension_numbers = #tpu.dot_dimension_numbers<[1], [0], [0], [1], [0, 0, 1, 1], [], []>, precision = #tpu.contract_precision<fp32>} : vector<20x32xf32>, vector<32x64xf32>, vector<20x64xf32> -> vector<20x64xf32>
    %5 = tpu.transpose %4, [1, 0] : vector<20x64xf32> -> vector<64x20xf32>
    %6 = vector.broadcast %1 : vector<1x20xf32> to vector<64x20xf32>
    %7 = arith.addf %5, %6 : vector<64x20xf32>
    %c0_6 = arith.constant 0 : index
    %c0_7 = arith.constant 0 : index
    %c0_8 = arith.constant 0 : index
    %8 = vector.load %arg5[%c0_6, %c0_7, %c0_8] : memref<2x64x20xf32, #tpu.memory_space<vmem>>, vector<1x64x20xf32>
    %9 = vector.shape_cast %8 : vector<1x64x20xf32> to vector<64x20xf32>
    %10 = vector.shape_cast %7 : vector<64x20xf32> to vector<1x64x20xf32>
    tpu.vector_store %arg5[%c0_6, %c0_7, %c0_8], %10 {strides = array<i32>} : memref<2x64x20xf32, #tpu.memory_space<vmem>>, vector<1x64x20xf32>,
    %c1 = arith.constant 1 : index
    %c0_9 = arith.constant 0 : index
    %c0_10 = arith.constant 0 : index
    %11 = vector.load %arg2[%c1, %c0_9, %c0_10] : memref<2x32x64xf32, #tpu.memory_space<vmem>>, vector<1x32x64xf32>
    %12 = vector.shape_cast %11 : vector<1x32x64xf32> to vector<32x64xf32>
    %cst_11 = arith.constant dense<0.000000e+00> : vector<20x64xf32>
    %13 = tpu.matmul %0, %12, %cst_11 {dimension_numbers = #tpu.dot_dimension_numbers<[1], [0], [0], [1], [0, 0, 1, 1], [], []>, precision = #tpu.contract_precision<fp32>} : vector<20x32xf32>, vector<32x64xf32>, vector<20x64xf32> -> vector<20x64xf32>
    %14 = tpu.transpose %13, [1, 0] : vector<20x64xf32> -> vector<64x20xf32>
    %15 = vector.broadcast %1 : vector<1x20xf32> to vector<64x20xf32>
    %16 = arith.addf %14, %15 : vector<64x20xf32>
    %c1_12 = arith.constant 1 : index
    %c0_13 = arith.constant 0 : index
    %c0_14 = arith.constant 0 : index
    %17 = vector.load %arg5[%c1_12, %c0_13, %c0_14] : memref<2x64x20xf32, #tpu.memory_space<vmem>>, vector<1x64x20xf32>
    %18 = vector.shape_cast %17 : vector<1x64x20xf32> to vector<64x20xf32>
    %19 = vector.shape_cast %16 : vector<64x20xf32> to vector<1x64x20xf32>
    tpu.vector_store %arg5[%c1_12, %c0_13, %c0_14], %19 {strides = array<i32>} : memref<2x64x20xf32, #tpu.memory_space<vmem>>, vector<1x64x20xf32>,
    return
  }
  func.func @transform_0(%arg0: i32, %arg1: i32) -> (i32, i32, i32) {
    %c0_i32 = arith.constant 0 : i32
    %c0_i32_0 = arith.constant 0 : i32
    return %arg0, %c0_i32, %arg1 : i32, i32, i32
  }
  func.func @transform_1(%arg0: i32, %arg1: i32) -> (i32, i32) {
    %c0_i32 = arith.constant 0 : i32
    %c0_i32_0 = arith.constant 0 : i32
    %c0_i32_1 = arith.constant 0 : i32
    return %c0_i32, %c0_i32_0 : i32, i32
  }
  func.func @transform_2(%arg0: i32, %arg1: i32) -> (i32, i32) {
    %c0_i32 = arith.constant 0 : i32
    %c0_i32_0 = arith.constant 0 : i32
    %c0_i32_1 = arith.constant 0 : i32
    return %c0_i32, %c0_i32_0 : i32, i32
  }
  func.func @transform_3(%arg0: i32, %arg1: i32) -> (i32, i32, i32) {
    %c0_i32 = arith.constant 0 : i32
    %c0_i32_0 = arith.constant 0 : i32
    return %arg0, %arg1, %c0_i32 : i32, i32, i32
  }
}

</mosaic_0001>

<bundles_post_ra>
// kernel: tpu_custom_call.1
= control target key start
LH: loop header
LB: loop body
LE: loop exit
PB: predicated region body
PF: predicated region fallthrough
CT: control target
= control target key end

     0   :  { %8 = vsyncpa [#allocation3], 0  ;;  %s3105_s0 = inlined_call_operand.hbm [shape: f32[3,32,64], index: 0, kind: input, shape index: {}]   ;;  %s3106_s1 = inlined_call_operand.hbm [shape: f32[20,32], index: 1, kind: input, shape index: {}]   ;;  %s3107_s2 = inlined_call_operand.vmem [shape: f32[1,20], index: 2, kind: input, shape index: {}]   ;;  %s3108_s3 = inlined_call_operand.vmem [shape: f32[3,64,20], index: 3, kind: output, shape index: {}]  }
   0x1   :  { %10 = vsyncpa [#allocation3 + $0x1], 0 }
   0x2   :  { %11 = vsyncpa [#allocation5], 0  ;;  %s2503_s12 = smov 0   ;;  %s2505_s13 = smov 0  }
   0x3   :  { %s2507_s14 = smov 0   ;;  %s2509_s15 = smov 0  }
   0x4   :  { %s2511_s16 = smov 0   ;;  %s2513_s17 = smov 0  }
   0x5 LB: > { %s1823_s18 = sadd.s32 4294967295, %s2441_s17   ;;  %s29_s19 = sadd.s32 1, %s2437_s16  ;;  %s2441_s17 = sphi %s2513_s17, %s17_s17   ;;  %s2437_s16 = sphi %s2511_s16, %s3124_s16   ;;  %s2433_s15 = sphi %s2509_s15, %s3123_s15   ;;  %s2429_s14 = sphi %s2507_s14, %s3122_s14   ;;  %s2425_s13 = sphi %s2505_s13, %s3121_s13   ;;  %s2421_s12 = sphi %s2503_s12, %s3120_s12  }
   0x6   : > { %p31_p0 = scmp.ge.s32.totalorder %s29_s19, 2  ;;  %s38_s20 = sadd.s32 1, %s2429_s14 }
   0x7   : > { %p45_p1 = scmp.ne.s32.totalorder %s2429_s14, %s2425_s13  ;;  %p46_p2 = scmp.eq.s32.totalorder %s2441_s17, 0 }
   0x8   : > { %s3126_s19 = smov (%p31_p0, %s29_s19), 0  ;;  %p51_p4 = scmp.ne.s32.totalorder %s2425_s13, %s2421_s12 }
   0x9   : > { %p2539_p3 = por %p46_p2, %p45_p1  ;;  %s33_s22 = ssub.s32 %s2437_s16, %s3126_s19 }
   0xa   : > { %p2546_p5 = scmp.eq.s32.totalorder %s1823_s18, 0  ;;  %p36_p6 = scmp.eq.s32.totalorder %s33_s22, 0 }
   0xb   : > { %p119_p7 = scmp.eq.s32.totalorder %s1823_s18, 1  ;;  %p1825_p9 = scmp.ge.s32.totalorder %s2441_s17, 1 }
   0xc   : > { %p2552_p8 = por %p2546_p5, %p51_p4  ;;  %p132_p11 = scmp.lt.s32.totalorder %s2441_s17, 3 }
   0xd   : > { %s2558_s25 = scalar_select %p36_p6, %s2429_s14, %s38_s20  }
   0xe   : > { %s3112_s24 = scalar_select %p2552_p8, 1, 0 }
   0xf   : > { %p2560_p10 = por %p119_p7, %p45_p1  ;;  %p2565_p12 = pnand %p1825_p9, %p132_p11 }
  0x10   : > { %s2475_s28 = smov [#allocation4]  }
  0x11   : > { %s3113_s26 = scalar_select %p2560_p10, 1, 0 }
  0x12   : > { %s144_s29 = sshll.u32 %s2475_s28, 4  ;;  %p2178_p13 = pneg %p2565_p12  ;;  %s145_s29 = int_to_ptr.vmem [resolvable:$true] %s144_s29 }
  0x13   : > { %s2314_s30 = scalar_lea.vmem %s145_s29, 384  ;;  %p2322_p7 = scmp.lt.s32.totalorder %s145_s29, %s145_s29 }
  0x14   : > { %p2179_p0 = pnand %p2178_p13, %p2546_p5  ;;  %p2315_p4 = scmp.ne.s32.totalorder %s145_s29, %s2314_s30 }
  0x15   : > { %p2323_p10 = scmp.lt.s32.totalorder %s2314_s30, %s2314_s30 }
  0x16   : > { %p2305_p2 = pneg %p2179_p0 }
  0x17   : > { %p2324_p8 = por %p2323_p10, %p2322_p7 }
  0x18   : > { %p2317_p1 = pnand %p2315_p4, %p2305_p2 }
  0x1a   : > { %p2318_p6 = pneg %p2317_p1 }
  0x1c   : > { %p2325_p9 = pnand %p2324_p8, %p2318_p6 }
  0x1e   : > { %2328 = shalt.err (!%p2325_p9)
}
  0x1f   : > { %s2476_s4 = smov 128   ;;  %s2477_s5 = smov 8  }
  0x20   : > { %2181 = dma.hbm_to_vmem [thread:$0]  (!%p2179_p0), %s3106_s1, 384, %s145_s29, [#allocation5], %s2476_s4, %s2476_s4, %s2477_s5  }
  0x21   : > { %p1827_p11 = scmp.ge.s32.totalorder %s2441_s17, 2 }
  0x23   : > { %157 = sbr.rel (%p1827_p11) target bundleno = 72 (0x48), region = 24 }
  0x28   : > { %160 = sbr.rel (!%p2539_p3) target bundleno = 72 (0x48), region = 28  ;;  %s161_s8 = sand.u32 (%p2539_p3), 1, %s2429_s14  }
  0x29   : > { %s1829_s9 = sshll.u32 (%p2539_p3), %s2437_s16, 1  ;;  %s1828_s10 = sshll.u32 (%p2539_p3), %s161_s8, 6 }
  0x2a   : > { %s167_s11 = ssub.s32 (%p2539_p3), 3, %s1829_s9  ;;  %s2584_s20 = scalar_lea.sflag (%p2539_p3), [#allocation3], %s161_s8 }
  0x2b   : > { %p168_p8 = scmp.lt.s32.totalorder (%p2539_p3), %s167_s11, 2  ;;  %s165_s22 = scalar_lea.vmem (%p2539_p3), [#allocation2], %s1828_s10 }
  0x2d   : > { %s3128_s11 = smov (!%p168_p8, %s167_s11), 2 }
  0x2e   : > { %s2581_s12 = sshll.u32 %s3128_s11, 9 }
  0x2f   : > { %s173_s18 = ssub.s32 1024, %s2581_s12 }
  0x30   : > { %174 = vsyncadd %s2584_s20, %s173_s18  ;;  %p1832_p3 = scmp.ne.s32.totalorder %s2581_s12, 0  ;;  %s1877_s21 = sshll.u32 %s2437_s16, 10 }
  0x31   : > { %s2592_s30 = scalar_lea.hbm %s3105_s0, %s1877_s21  ;;  %s182_s4 = sshll.u32 %s165_s22, 4  ;;  %s2594_s4 = int_to_ptr.vmem [resolvable:$true] %s182_s4 }
  0x32   : > { %s2329_s5 = scalar_lea.hbm %s2592_s30, %s2581_s12  ;;  %s2333_s8 = scalar_lea.hbm %s3105_s0, 1536 }
  0x33   : > { %p2330_p10 = scmp.ne.s32.totalorder %s2592_s30, %s2329_s5  ;;  %p2335_p2 = scmp.lt.s32.totalorder %s2333_s8, %s2329_s5 }
  0x35   : > { %p2331_p13 = pnand %p2330_p10, %p1832_p3 }
  0x37   : > { %p2332_p0 = pneg %p2331_p13 }
  0x39   : > { %p2337_p4 = pnand %p2335_p2, %p2332_p0 }
  0x3b   : > { %2340 = shalt.err (!%p2337_p4)
}
  0x3c   : > { %s2341_s9 = scalar_lea.vmem %s2594_s4, %s2581_s12  ;;  %s2478_s10 = smov [#allocation2]  }
  0x3d   : > { %p2342_p1 = scmp.ne.s32.totalorder %s2594_s4, %s2341_s9  ;;  %s2345_s11 = sshll.u32 %s2478_s10, 4  ;;  %s2346_s11 = int_to_ptr.vmem [resolvable:$false] %s2345_s11 }
  0x3e   : > { %s2347_s18 = scalar_lea.vmem %s2346_s11, 2048  ;;  %p2348_p9 = scmp.lt.s32.totalorder %s2594_s4, %s2346_s11 }
  0x3f   : > { %p2343_p6 = pnand %p2342_p1, %p1832_p3  ;;  %p2349_p11 = scmp.lt.s32.totalorder %s2347_s18, %s2341_s9 }
  0x41   : > { %p2344_p7 = pneg %p2343_p6  ;;  %p2350_p8 = por %p2349_p11, %p2348_p9 }
  0x43   : > { %p2351_p10 = pnand %p2350_p8, %p2344_p7 }
  0x45   : > { %2354 = shalt.err (!%p2351_p10)
}
  0x46   : > { %s2479_s22 = smov 128   ;;  %s2480_s21 = smov 8  }
  0x47   : > { %188 = dma.hbm_to_vmem [thread:$0]  (%p1832_p3), %s2592_s30, %s2581_s12, %s2594_s4, %s2584_s20, %s2479_s22, %s2479_s22, %s2480_s21  }
  0x48 PF: > { %194 = sbr.rel (%p2565_p12) target bundleno = 560 (0x230), region = 32  ;;  %s2619_s28 = sand.u32 (!%p2565_p12), 1, %s2425_s13  }
  0x49   : > { %s1839_s29 = sshll.u32 (!%p2565_p12), %s2619_s28, 6  ;;  %s197_s5 = scalar_lea.sflag (!%p2565_p12), [#allocation3], %s2619_s28 }
  0x4a   : > { %s2623_s6 = scalar_lea.vmem (!%p2565_p12), [#allocation2], %s1839_s29  ;;  %p3115_p13 = scmp.ne.s32.totalorder (!%p2565_p12), %s3112_s24, 0 }
  0x4d   : > { %2412 = dma.done.wait (%p3115_p13), %s197_s5, 1024  }
  0x4e   : > { %2414 = vsyncadd (%p3115_p13), %s197_s5, 4294966272 }
  0x4f   : > { %2416 = dma.done.wait (%p2546_p5), [#allocation5], 384  }
  0x50   : > { %2418 = vsyncadd (%p2546_p5), [#allocation5], 4294966912  ;;  %v2481_v0 = vmov 0.0   ;;  %vm2482_vm0 = vmmov 0   ;;  %vm247_vm1 = vcmask 261120   ;;  %v246_v1 = vld [vmem:[%s2623_s6 + $0x18] sm:$0xff] }
  0x51   : > { %1969 = vmatprep.subr.mxu0 %v2481_v0  ;;  %1986 = vmatprep.subr.mxu1 %v2481_v0  ;;  %v245_v2 = vld [vmem:[%s2623_s6 + $0x10] sm:$0xff]  ;;  %v244_v3 = vld [vmem:[%s2623_s6 + $0x8] sm:$0xff]  ;;  %v2642_v4 = vand.u32 4294901760, %v246_v1  ;;  %v243_v7 = vld [vmem:[%s2623_s6] sm:$0xff]  ;;  %s1841_s23 = sshll.u32 %s2619_s28, 7  ;;  %vm874_vm2 = vcmask 162816  }
  0x52   : > { %1977 = vmatprep.mubr.msk.f32.mxu0 %vm2482_vm0, %v2481_v0  ;;  %1994 = vmatprep.mubr.msk.f32.mxu1 %vm2482_vm0, %v2481_v0  ;;  %v2644_v5 = vand.u32 4294901760, %v245_v2  ;;  %v2646_v6 = vand.u32 4294901760, %v244_v3  ;;  %v239_v8 = vld [vmem:[#allocation4] sm:$0xff]  ;;  %v240_v9 = vld [vmem:[#allocation4 + $0x8] sm:$0xff]  ;;  %v2649_v10 = vand.u32 4294901760, %v243_v7  ;;  %v1846_v46 = vld [vmem:[%s2623_s6 + $0x38] sm:$0xff] }
  0x53   : > { %v249_v11 = vsel %vm247_vm1, %v239_v8, 0  ;;  %v252_v12 = vsel %vm247_vm1, %v240_v9, 0  ;;  %v241_v13 = vld [vmem:[#allocation4 + $0x10] sm:$0xf]  ;;  %1970 = vmatpush3.msra.mxu0 %v2642_v4  ;;  %v2655_v14 = vsub.f32 %v246_v1, %v2642_v4  ;;  %v2763_v47 = vand.u32 4294901760, %v1846_v46  ;;  %v1844_v51 = vld [vmem:[%s2623_s6 + $0x28] sm:$0xff] }
  0x54   : > { %v2657_v15 = vand.u32 4294901760, %v249_v11  ;;  %v2660_v16 = vsub.f32 %v245_v2, %v2644_v5  ;;  %v2663_v17 = vsub.f32 %v244_v3, %v2646_v6  ;;  %1971 = vmatprep.subr.mxu0 %v2481_v0  ;;  %v2666_v18 = vand.u32 4294901760, %v252_v12  ;;  %v1845_v48 = vld [vmem:[%s2623_s6 + $0x30] sm:$0xff]  ;;  %v1843_v52 = vld [vmem:[%s2623_s6 + $0x20] sm:$0xff]  ;;  %s2960_s12 = scalar_lea.vmem [#allocation6], %s1841_s23   ;;  %p3116_p5 = scmp.ne.s32.totalorder %s3113_s26, 0 }
  0x55   : > { %v2669_v19 = vsub.f32 %v243_v7, %v2649_v10  ;;  %v255_v20 = vsel %vm247_vm1, %v241_v13, 0  ;;  %1972 = vmatpush3.msra.mxu0 %v2644_v5  ;;  %v383_v21 = vand.u32 4294901760, %v2655_v14  ;;  %v2777_v49 = vsub.f32 %v1846_v46, %v2763_v47  ;;  %s1856_s20 = sshll.u32 (%p3116_p5), %s2433_s15, 1  ;;  %s1882_s30 = sshll.u32 (%p3116_p5), %s2433_s15, 7 }
  0x56   : > { %v2675_v22 = vsub.f32 %v249_v11, %v2657_v15  ;;  %v390_v23 = vand.u32 4294901760, %v2660_v16  ;;  %v397_v24 = vand.u32 4294901760, %v2663_v17  ;;  %1973 = vmatprep.subr.mxu0 %v2481_v0  ;;  %v2681_v25 = vsub.f32 %v252_v12, %v2666_v18  ;;  %s1517_s4 = ssub.s32 (%p3116_p5), 3, %s1856_s20  ;;  %s3001_s9 = scalar_lea.vmem (%p3116_p5), %s3108_s3, %s1882_s30  }
  0x57   : > { %v404_v26 = vand.u32 4294901760, %v2669_v19  ;;  %v2684_v27 = vand.u32 4294901760, %v255_v20  ;;  %1974 = vmatpush3.msra.mxu0 %v2646_v6  ;;  %v384_v28 = vsub.f32 %v2655_v14, %v383_v21  ;;  %v2779_v50 = vand.u32 4294901760, %v1845_v48  ;;  %p1518_p12 = scmp.lt.s32.totalorder (%p3116_p5), %s1517_s4, 2 }
  0x58   : > { %v2691_v29 = vand.u32 4294901760, %v2675_v22  ;;  %v391_v30 = vsub.f32 %v2660_v16, %v390_v23  ;;  %v398_v31 = vsub.f32 %v2663_v17, %v397_v24  ;;  %1975 = vmatprep.subr.mxu0 %v2481_v0  ;;  %v2701_v32 = vand.u32 4294901760, %v2681_v25 }
  0x59   : > { %v2704_v33 = vsub.f32 %v255_v20, %v2684_v27  ;;  %1976 = vmatpush3.msra.mxu0 %v2649_v10  ;;  %v385_v34 = vand.u32 4294901760, %v384_v28  ;;  %v405_v37 = vsub.f32 %v2669_v19, %v404_v26  ;;  %v2792_v53 = vand.u32 4294901760, %v1844_v51 }
  0x5a   : > { %v329_v35 = vsub.f32 %v2675_v22, %v2691_v29  ;;  %v392_v36 = vand.u32 4294901760, %v391_v30  ;;  %v339_v38 = vsub.f32 %v2681_v25, %v2701_v32  ;;  %2003 = vmatprep.subr.mxu0 %v2481_v0  ;;  %v399_v41 = vand.u32 4294901760, %v398_v31 }
  0x5b   : > { %v2716_v39 = vand.u32 4294901760, %v2704_v33  ;;  %1987 = vmatpush3.msra.mxu1 %v385_v34  ;;  %v406_v43 = vand.u32 4294901760, %v405_v37  ;;  %v2798_v54 = vsub.f32 %v1845_v48, %v2779_v50  ;;  %v1014_v55 = vand.u32 4294901760, %v2777_v49 }
  0x5c   : > { %v2718_v40 = vand.u32 4294901760, %v329_v35  ;;  %1988 = vmatprep.subr.mxu1 %v2481_v0  ;;  %v2722_v42 = vand.u32 4294901760, %v339_v38  ;;  %v2803_v56 = vand.u32 4294901760, %v1843_v52  ;;  %v2812_v57 = vsub.f32 %v1844_v51, %v2792_v53 }
  0x5d   : > { %1989 = vmatpush3.msra.mxu1 %v392_v36  ;;  %v349_v44 = vsub.f32 %v2704_v33, %v2716_v39  ;;  %v1015_v58 = vsub.f32 %v2777_v49, %v1014_v55  ;;  %v1021_v59 = vand.u32 4294901760, %v2798_v54 }
  0x5e   : > { %1978 = vmatmul.mubr.f32.vlgmr.msra.gmra.mxu0 %v2718_v40  ;;  %1990 = vmatprep.subr.mxu1 %v2481_v0  ;;  %v2825_v60 = vsub.f32 %v1843_v52, %v2803_v56  ;;  %v1028_v61 = vand.u32 4294901760, %v2812_v57 }
  0x5f   : > { %1980 = vmatprep.mubr.msk.f32.mxu0 %vm2482_vm0, %v2481_v0  ;;  %1991 = vmatpush3.msra.mxu1 %v399_v41  ;;  %v2733_v45 = vand.u32 4294901760, %v349_v44  ;;  %v1016_v62 = vand.u32 4294901760, %v1015_v58  ;;  %v1022_v63 = vsub.f32 %v2798_v54, %v1021_v59 }
  0x60   : > { %2004 = vmatpush3.msra.mxu0 %v2655_v14  ;;  %1992 = vmatprep.subr.mxu1 %v2481_v0  ;;  %v1035_v1 = vand.u32 4294901760, %v2825_v60  ;;  %v1029_v2 = vsub.f32 %v2812_v57, %v1028_v61 }
  0x61   : > { %2005 = vmatprep.subr.mxu0 %v2481_v0  ;;  %1993 = vmatpush3.msra.mxu1 %v406_v43  ;;  %v1023_v3 = vand.u32 4294901760, %v1022_v63 }
  0x62   : > { %1981 = vmatmul.mubr.f32.gmra.mxu0 %v2722_v42  ;;  %1995 = vmatmul.mubr.f32.vlgmr.msra.gmra.mxu1 %v2657_v15 }
  0x63   : > { %2020 = vmatprep.subr.mxu1 %v2481_v0  ;;  %1983 = vmatprep.mubr.msk.f32.mxu0 %vm2482_vm0, %v2481_v0 }
  0x64   : > { %2006 = vmatpush3.msra.mxu0 %v2660_v16  ;;  %2021 = vmatpush3.msra.mxu1 %v2642_v4 }
  0x65   : > { %2007 = vmatprep.subr.mxu0 %v2481_v0  ;;  %1997 = vmatprep.mubr.msk.f32.mxu1 %vm2482_vm0, %v2481_v0 }
  0x66   : > { %1984 = vmatmul.mubr.f32.gmra.mxu0 %v2733_v45  ;;  %2022 = vmatprep.subr.mxu1 %v2481_v0 }
  0x67   : > { %2008 = vmatpush3.msra.mxu0 %v2663_v17  ;;  %1998 = vmatmul.mubr.f32.gmra.mxu1 %v2666_v18 }
  0x68   : > { %2009 = vmatprep.subr.mxu0 %v2481_v0  ;;  %2023 = vmatpush3.msra.mxu1 %v2644_v5 }
  0x69   : > { %2010 = vmatpush3.msra.mxu0 %v2669_v19  ;;  %2011 = vmatprep.mubr.msk.f32.mxu0 %vm2482_vm0, %v2481_v0 }
  0x6a   : > { %2024 = vmatprep.subr.mxu1 %v2481_v0  ;;  %2012 = vmatmul.mubr.f32.vlgmr.msra.gmra.mxu0 %v2675_v22 }
  0x6b   : > { %2000 = vmatprep.mubr.msk.f32.mxu1 %vm2482_vm0, %v2481_v0  ;;  %2025 = vmatpush3.msra.mxu1 %v2646_v6 }
  0x6c   : > { %2014 = vmatprep.mubr.msk.f32.mxu0 %vm2482_vm0, %v2481_v0  ;;  %2001 = vmatmul.mubr.f32.gmra.mxu1 %v2684_v27 }
  0x6d   : > { %2026 = vmatprep.subr.mxu1 %v2481_v0  ;;  %2037 = vmatprep.subr.mxu0 %v2481_v0 }
  0x6e   : > { %2027 = vmatpush3.msra.mxu1 %v2649_v10  ;;  %2015 = vmatmul.mubr.f32.gmra.mxu0 %v2681_v25 }
  0x6f   : > { %2028 = vmatprep.mubr.msk.f32.mxu1 %vm2482_vm0, %v2481_v0  ;;  %2038 = vmatpush3.msra.mxu0 %v383_v21 }
  0x70   : > { %2054 = vmatprep.subr.mxu1 %v2481_v0  ;;  %2029 = vmatmul.mubr.f32.vlgmr.msra.gmra.mxu1 %v2691_v29 }
  0x71   : > { %2039 = vmatprep.subr.mxu0 %v2481_v0  ;;  %2017 = vmatprep.mubr.msk.f32.mxu0 %vm2482_vm0, %v2481_v0 }
  0x72   : > { %2040 = vmatpush3.msra.mxu0 %v390_v23  ;;  %2055 = vmatpush3.msra.mxu1 %v2642_v4  ;;  %v1036_v4 = vsub.f32 %v2825_v60, %v1035_v1 }
  0x73   : > { %2018 = vmatmul.mubr.f32.gmra.mxu0 %v2704_v33  ;;  %2041 = vmatprep.subr.mxu0 %v2481_v0 }
  0x74   : > { %2031 = vmatprep.mubr.msk.f32.mxu1 %vm2482_vm0, %v2481_v0  ;;  %2042 = vmatpush3.msra.mxu0 %v397_v24 }
  0x75   : > { %2056 = vmatprep.subr.mxu1 %v2481_v0  ;;  %2032 = vmatmul.mubr.f32.gmra.mxu1 %v2701_v32 }
  0x76   : > { %2043 = vmatprep.subr.mxu0 %v2481_v0  ;;  %2057 = vmatpush3.msra.mxu1 %v2644_v5  ;;  %v1030_v5 = vand.u32 4294901760, %v1029_v2 }
  0x77   : > { %2044 = vmatpush3.msra.mxu0 %v404_v26  ;;  %2045 = vmatprep.mubr.msk.f32.mxu0 %vm2482_vm0, %v2481_v0 }
  0x78   : > { %2058 = vmatprep.subr.mxu1 %v2481_v0  ;;  %2046 = vmatmul.mubr.f32.vlgmr.msra.gmra.mxu0 %v2657_v15 }
  0x79   : > { %2034 = vmatprep.mubr.msk.f32.mxu1 %vm2482_vm0, %v2481_v0  ;;  %2059 = vmatpush3.msra.mxu1 %v2646_v6  ;;  %v1037_v6 = vand.u32 4294901760, %v1036_v4 }
  0x7a   : > { %2048 = vmatprep.mubr.msk.f32.mxu0 %vm2482_vm0, %v2481_v0  ;;  %2035 = vmatmul.mubr.f32.gmra.mxu1 %v2716_v39 }
  0x7b   : > { %2060 = vmatprep.subr.mxu1 %v2481_v0  ;;  %2071 = vmatprep.subr.mxu0 %v2481_v0 }
  0x7c   : > { %2061 = vmatpush3.msra.mxu1 %v2649_v10  ;;  %2049 = vmatmul.mubr.f32.gmra.mxu0 %v2666_v18 }
  0x7d   : > { %2062 = vmatprep.mubr.msk.f32.mxu1 %vm2482_vm0, %v2481_v0  ;;  %2072 = vmatpush3.msra.mxu0 %v2763_v47 }
  0x7e   : > { %2088 = vmatprep.subr.mxu1 %v2481_v0  ;;  %2063 = vmatmul.mubr.f32.vlgmr.msra.gmra.mxu1 %v2657_v15 }
  0x7f   : > { %2073 = vmatprep.subr.mxu0 %v2481_v0  ;;  %2051 = vmatprep.mubr.msk.f32.mxu0 %vm2482_vm0, %v2481_v0 }
  0x80   : > { %2074 = vmatpush3.msra.mxu0 %v2779_v50  ;;  %2089 = vmatpush3.msra.mxu1 %v1016_v62 }
  0x81   : > { %2052 = vmatmul.mubr.f32.gmra.mxu0 %v2684_v27  ;;  %2075 = vmatprep.subr.mxu0 %v2481_v0 }
  0x82   : > { %2065 = vmatprep.mubr.msk.f32.mxu1 %vm2482_vm0, %v2481_v0  ;;  %2076 = vmatpush3.msra.mxu0 %v2792_v53 }
  0x83   : > { %2090 = vmatprep.subr.mxu1 %v2481_v0  ;;  %2066 = vmatmul.mubr.f32.gmra.mxu1 %v2666_v18 }
  0x84   : > { %2077 = vmatprep.subr.mxu0 %v2481_v0  ;;  %2091 = vmatpush3.msra.mxu1 %v1023_v3 }
  0x85   : > { %2078 = vmatpush3.msra.mxu0 %v2803_v56  ;;  %2079 = vmatprep.mubr.msk.f32.mxu0 %vm2482_vm0, %v2481_v0 }
  0x86   : > { %2092 = vmatprep.subr.mxu1 %v2481_v0  ;;  %2080 = vmatmul.mubr.f32.vlgmr.msra.gmra.mxu0 %v2718_v40 }
  0x87   : > { %2068 = vmatprep.mubr.msk.f32.mxu1 %vm2482_vm0, %v2481_v0  ;;  %2093 = vmatpush3.msra.mxu1 %v1030_v5 }
  0x88   : > { %2082 = vmatprep.mubr.msk.f32.mxu0 %vm2482_vm0, %v2481_v0  ;;  %2069 = vmatmul.mubr.f32.gmra.mxu1 %v2684_v27 }
  0x89   : > { %2094 = vmatprep.subr.mxu1 %v2481_v0  ;;  %2105 = vmatprep.subr.mxu0 %v2481_v0 }
  0x8a   : > { %2095 = vmatpush3.msra.mxu1 %v1037_v6  ;;  %2083 = vmatmul.mubr.f32.gmra.mxu0 %v2722_v42 }
  0x8b   : > { %2096 = vmatprep.mubr.msk.f32.mxu1 %vm2482_vm0, %v2481_v0  ;;  %2106 = vmatpush3.msra.mxu0 %v2777_v49 }
  0x8c   : > { %2122 = vmatprep.subr.mxu1 %v2481_v0  ;;  %2097 = vmatmul.mubr.f32.vlgmr.msra.gmra.mxu1 %v2657_v15 }
  0x8d   : > { %2107 = vmatprep.subr.mxu0 %v2481_v0  ;;  %2085 = vmatprep.mubr.msk.f32.mxu0 %vm2482_vm0, %v2481_v0 }
  0x8e   : > { %2108 = vmatpush3.msra.mxu0 %v2798_v54  ;;  %2123 = vmatpush3.msra.mxu1 %v2763_v47 }
  0x8f   : > { %2086 = vmatmul.mubr.f32.gmra.mxu0 %v2733_v45  ;;  %2109 = vmatprep.subr.mxu0 %v2481_v0 }
  0x90   : > { %2099 = vmatprep.mubr.msk.f32.mxu1 %vm2482_vm0, %v2481_v0  ;;  %2110 = vmatpush3.msra.mxu0 %v2812_v57 }
  0x91   : > { %2124 = vmatprep.subr.mxu1 %v2481_v0  ;;  %2100 = vmatmul.mubr.f32.gmra.mxu1 %v2666_v18 }
  0x92   : > { %2111 = vmatprep.subr.mxu0 %v2481_v0  ;;  %2125 = vmatpush3.msra.mxu1 %v2779_v50 }
  0x93   : > { %2112 = vmatpush3.msra.mxu0 %v2825_v60  ;;  %2113 = vmatprep.mubr.msk.f32.mxu0 %vm2482_vm0, %v2481_v0 }
  0x94   : > { %2126 = vmatprep.subr.mxu1 %v2481_v0  ;;  %2114 = vmatmul.mubr.f32.vlgmr.msra.gmra.mxu0 %v2675_v22 }
  0x95   : > { %2102 = vmatprep.mubr.msk.f32.mxu1 %vm2482_vm0, %v2481_v0  ;;  %2127 = vmatpush3.msra.mxu1 %v2792_v53 }
  0x96   : > { %2116 = vmatprep.mubr.msk.f32.mxu0 %vm2482_vm0, %v2481_v0  ;;  %2103 = vmatmul.mubr.f32.gmra.mxu1 %v2684_v27 }
  0x97   : > { %2128 = vmatprep.subr.mxu1 %v2481_v0  ;;  %2139 = vmatprep.subr.mxu0 %v2481_v0 }
  0x98   : > { %2129 = vmatpush3.msra.mxu1 %v2803_v56  ;;  %2117 = vmatmul.mubr.f32.gmra.mxu0 %v2681_v25 }
  0x99   : > { %2130 = vmatprep.mubr.msk.f32.mxu1 %vm2482_vm0, %v2481_v0  ;;  %2140 = vmatpush3.msra.mxu0 %v1014_v55 }
  0x9a   : > { %2156 = vmatprep.subr.mxu1 %v2481_v0  ;;  %2131 = vmatmul.mubr.f32.vlgmr.msra.gmra.mxu1 %v2691_v29 }
  0x9b   : > { %2141 = vmatprep.subr.mxu0 %v2481_v0  ;;  %2119 = vmatprep.mubr.msk.f32.mxu0 %vm2482_vm0, %v2481_v0 }
  0x9c   : > { %2142 = vmatpush3.msra.mxu0 %v1021_v59  ;;  %2157 = vmatpush3.msra.mxu1 %v2763_v47 }
  0x9d   : > { %2120 = vmatmul.mubr.f32.gmra.mxu0 %v2704_v33  ;;  %2143 = vmatprep.subr.mxu0 %v2481_v0 }
  0x9e   : > { %2133 = vmatprep.mubr.msk.f32.mxu1 %vm2482_vm0, %v2481_v0  ;;  %2144 = vmatpush3.msra.mxu0 %v1028_v61 }
  0x9f   : > { %2158 = vmatprep.subr.mxu1 %v2481_v0  ;;  %2134 = vmatmul.mubr.f32.gmra.mxu1 %v2701_v32 }
  0xa0   : > { %2145 = vmatprep.subr.mxu0 %v2481_v0  ;;  %2159 = vmatpush3.msra.mxu1 %v2779_v50 }
  0xa1   : > { %2146 = vmatpush3.msra.mxu0 %v1035_v1  ;;  %2147 = vmatprep.mubr.msk.f32.mxu0 %vm2482_vm0, %v2481_v0 }
  0xa2   : > { %2160 = vmatprep.subr.mxu1 %v2481_v0  ;;  %2148 = vmatmul.mubr.f32.vlgmr.msra.gmra.mxu0 %v2657_v15 }
  0xa3   : > { %2136 = vmatprep.mubr.msk.f32.mxu1 %vm2482_vm0, %v2481_v0  ;;  %2161 = vmatpush3.msra.mxu1 %v2792_v53 }
  0xa4   : > { %2150 = vmatprep.mubr.msk.f32.mxu0 %vm2482_vm0, %v2481_v0  ;;  %2137 = vmatmul.mubr.f32.gmra.mxu1 %v2716_v39 }
  0xa5   : > { %2162 = vmatprep.subr.mxu1 %v2481_v0  ;;  %2164 = vmatprep.mubr.msk.f32.mxu1 %vm2482_vm0, %v2481_v0 }
  0xa6   : > { %2163 = vmatpush3.msra.mxu1 %v2803_v56  ;;  %2151 = vmatmul.mubr.f32.gmra.mxu0 %v2666_v18 }
  0xa7   : > { %2153 = vmatprep.mubr.msk.f32.mxu0 %vm2482_vm0, %v2481_v0 }
  0xa8   : > { %2165 = vmatmul.mubr.f32.vlgmr.msra.gmra.mxu1 %v2657_v15 }
  0xa9   : > { %2167 = vmatprep.mubr.msk.f32.mxu1 %vm2482_vm0, %v2481_v0 }
  0xaa   : > { %2154 = vmatmul.mubr.f32.gmra.mxu0 %v2684_v27 }
  0xac   : > { %2168 = vmatmul.mubr.f32.gmra.mxu1 %v2666_v18 }
  0xad   : > { %2170 = vmatprep.mubr.msk.f32.mxu1 %vm2482_vm0, %v2481_v0 }
  0xb0   : > { %2171 = vmatmul.mubr.f32.gmra.mxu1 %v2684_v27 }
 0x11e   : > { %v332_v7 = vpop.f32.mrf.mxu0 }
 0x120   : > { %v1979_v8 = vpop.f32.mrf.mxu0 }
 0x122   : > { %v342_v9 = vpop.f32.mrf.mxu0  ;;  %v443_v10 = vpop.f32.mrf.mxu1 }
 0x123   : > { %v444_v27 = vadd.f32 %v443_v10, %v332_v7 }
 0x124   : > { %v1982_v11 = vpop.f32.mrf.mxu0  ;;  %v1996_v12 = vpop.f32.mrf.mxu1 }
 0x126   : > { %v352_v13 = vpop.f32.mrf.mxu0 }
 0x127   : > { %v449_v15 = vpop.f32.mrf.mxu1 }
 0x128   : > { %v1985_v14 = vpop.f32.mrf.mxu0  ;;  %v450_v34 = vadd.f32 %v449_v15, %v342_v9 }
 0x129   : > { %v1999_v16 = vpop.f32.mrf.mxu1 }
 0x12a   : > { %v535_v17 = vpop.f32.mrf.mxu0 }
 0x12b   : > { %v536_v30 = vadd.f32 %v535_v17, %v444_v27 }
 0x12c   : > { %v455_v19 = vpop.f32.mrf.mxu1  ;;  %v2013_v20 = vpop.f32.mrf.mxu0 }
 0x12d   : > { %v456_v45 = vadd.f32 %v455_v19, %v352_v13 }
 0x12e   : > { %v2002_v21 = vpop.f32.mrf.mxu1  ;;  %v542_v18 = vpop.f32.mrf.mxu0 }
 0x12f   : > { %v543_v38 = vadd.f32 %v542_v18, %v450_v34 }
 0x130   : > { %v2016_v22 = vpop.f32.mrf.mxu0  ;;  %v626_v23 = vpop.f32.mrf.mxu1 }
 0x131   : > { %v627_v33 = vadd.f32 %v626_v23, %v536_v30 }
 0x132   : > { %v2030_v24 = vpop.f32.mrf.mxu1 }
 0x133   : > { %v549_v0 = vpop.f32.mrf.mxu0 }
 0x134   : > { %v550_v48 = vadd.f32 %v549_v0, %v456_v45 }
 0x135   : > { %v2019_v25 = vpop.f32.mrf.mxu0  ;;  %v634_v26 = vpop.f32.mrf.mxu1 }
 0x136   : > { %v635_v42 = vadd.f32 %v634_v26, %v543_v38 }
 0x137   : > { %v2033_v28 = vpop.f32.mrf.mxu1 }
 0x138   : > { %v725_v29 = vpop.f32.mrf.mxu0 }
 0x139   : > { %v726_v37 = vadd.f32 %v725_v29, %v627_v33 }
 0x13a   : > { %v642_v31 = vpop.f32.mrf.mxu1  ;;  %v2047_v32 = vpop.f32.mrf.mxu0 }
 0x13b   : > { %v643_v51 = vadd.f32 %v642_v31, %v550_v48 }
 0x13c   : > { %v2036_v35 = vpop.f32.mrf.mxu1  ;;  %v731_v36 = vpop.f32.mrf.mxu0 }
 0x13d   : > { %v732_v46 = vadd.f32 %v731_v36, %v635_v42 }
 0x13e   : > { %v2050_v39 = vpop.f32.mrf.mxu0  ;;  %v812_v40 = vpop.f32.mrf.mxu1 }
 0x13f   : > { %v813_v41 = vadd.f32 %v812_v40, %v726_v37 }
 0x140   : > { %v2064_v44 = vpop.f32.mrf.mxu1 }
 0x141   : > { %v737_v43 = vpop.f32.mrf.mxu0  ;;  %828 = vxpose.xlu0.b32.start [1/3] (short) (narrow) %v813_v41, 64  ;;  %v1842_v44 = vld [vmem:[%s3107_s2] ss:$0 sm:$0xff] }
 0x142   : > { %v738_v54 = vadd.f32 %v737_v43, %v643_v51 }
 0x143   : > { %v2053_v47 = vpop.f32.mrf.mxu0  ;;  %v818_v49 = vpop.f32.mrf.mxu1 }
 0x144   : > { %v819_v50 = vadd.f32 %v818_v49, %v732_v46 }
 0x145   : > { %v2067_v52 = vpop.f32.mrf.mxu1 }
 0x146   : > { %v963_v53 = vpop.f32.mrf.mxu0  ;;  %829 = vxpose.xlu0.b32.cont [2/3] (short) (narrow) %v819_v50, 64 }
 0x148   : > { %v824_v55 = vpop.f32.mrf.mxu1  ;;  %v2081_v56 = vpop.f32.mrf.mxu0 }
 0x149   : > { %v825_v57 = vadd.f32 %v824_v55, %v738_v54 }
 0x14a   : > { %v2070_v58 = vpop.f32.mrf.mxu1  ;;  %v973_v59 = vpop.f32.mrf.mxu0 }
 0x14b   : > { %830 = vxpose.xlu0.b32.end [3/3] (short) (narrow) %v825_v57, 64 }
 0x14c   : > { %v2084_v60 = vpop.f32.mrf.mxu0  ;;  %v1074_v61 = vpop.f32.mrf.mxu1 }
 0x14d   : > { %v1075_v15 = vadd.f32 %v1074_v61, %v963_v53 }
 0x14e   : > { %v2098_v63 = vpop.f32.mrf.mxu1 }
 0x14f   : > { %v983_v62 = vpop.f32.mrf.mxu0 }
 0x151   : > { %v2087_v1 = vpop.f32.mrf.mxu0  ;;  %v1080_v2 = vpop.f32.mrf.mxu1 }
 0x152   : > { %v1081_v18 = vadd.f32 %v1080_v2, %v973_v59 }
 0x153   : > { %v2101_v3 = vpop.f32.mrf.mxu1 }
 0x154   : > { %v1166_v4 = vpop.f32.mrf.mxu0 }
 0x155   : > { %v1167_v19 = vadd.f32 %v1166_v4, %v1075_v15 }
 0x156   : > { %v1086_v5 = vpop.f32.mrf.mxu1  ;;  %v2115_v6 = vpop.f32.mrf.mxu0 }
 0x157   : > { %v1087_v28 = vadd.f32 %v1086_v5, %v983_v62 }
 0x158   : > { %v2104_v7 = vpop.f32.mrf.mxu1  ;;  %v1173_v8 = vpop.f32.mrf.mxu0 }
 0x159   : > { %v1174_v24 = vadd.f32 %v1173_v8, %v1081_v18 }
 0x15a   : > { %v2118_v9 = vpop.f32.mrf.mxu0  ;;  %v1257_v10 = vpop.f32.mrf.mxu1 }
 0x15b   : > { %v1258_v22 = vadd.f32 %v1257_v10, %v1167_v19 }
 0x15c   : > { %v2132_v12 = vpop.f32.mrf.mxu1 }
 0x15d   : > { %v1180_v11 = vpop.f32.mrf.mxu0 }
 0x15e   : > { %v1181_v33 = vadd.f32 %v1180_v11, %v1087_v28 }
 0x15f   : > { %v2121_v13 = vpop.f32.mrf.mxu0  ;;  %v1265_v14 = vpop.f32.mrf.mxu1 }
 0x160   : > { %v1266_v29 = vadd.f32 %v1265_v14, %v1174_v24 }
 0x161   : > { %v2135_v16 = vpop.f32.mrf.mxu1 }
 0x162   : > { %v1356_v17 = vpop.f32.mrf.mxu0 }
 0x163   : > { %v1357_v25 = vadd.f32 %v1356_v17, %v1258_v22 }
 0x164   : > { %v1273_v20 = vpop.f32.mrf.mxu1  ;;  %v2149_v21 = vpop.f32.mrf.mxu0 }
 0x165   : > { %v1274_v37 = vadd.f32 %v1273_v20, %v1181_v33 }
 0x166   : > { %v2138_v23 = vpop.f32.mrf.mxu1  ;;  %v1362_v0 = vpop.f32.mrf.mxu0 }
 0x167   : > { %v1363_v34 = vadd.f32 %v1362_v0, %v1266_v29 }
 0x168   : > { %v2152_v26 = vpop.f32.mrf.mxu0  ;;  %v1443_v27 = vpop.f32.mrf.mxu1 }
 0x169   : > { %v1444_v30 = vadd.f32 %v1443_v27, %v1357_v25 }
 0x16a   : > { %v1368_v31 = vpop.f32.mrf.mxu0  ;;  %v2166_v32 = vpop.f32.mrf.mxu1 }
 0x16b   : > { %1459 = vxpose.xlu1.b32.start [1/3] (short) (narrow) %v1444_v30, 64  ;;  %v1369_v40 = vadd.f32 %v1368_v31, %v1274_v37 }
 0x16c   : > { %v1449_v35 = vpop.f32.mrf.mxu1  ;;  %v2155_v36 = vpop.f32.mrf.mxu0 }
 0x16d   : > { %v1450_v38 = vadd.f32 %v1449_v35, %v1363_v34 }
 0x16e   : > { %v2169_v39 = vpop.f32.mrf.mxu1 }
 0x16f   : > { %1460 = vxpose.xlu1.b32.cont [2/3] (short) (narrow) %v1450_v38, 64 }
 0x170   : > { %v1455_v41 = vpop.f32.mrf.mxu1 }
 0x171   : > { %v1456_v42 = vadd.f32 %v1455_v41, %v1369_v40 }
 0x172   : > { %v2172_v43 = vpop.f32.mrf.mxu1 }
 0x173   : > { %1461 = vxpose.xlu1.b32.end [3/3] (short) (narrow) %v1456_v42, 64 }
 0x1bf   : > { %v844_v45 = vpop.trf.xlu0 }
 0x1c0   : > { %v866_v46 = vadd.f32 %v1842_v44, %v844_v45 }
 0x1c2   : > { %875 = vst.msk [vmem:[%s2960_s12] sm:$0xff] %vm874_vm2, %v866_v46 }
 0x1c3   : > { %v845_v47 = vpop.trf.xlu0 }
 0x1c4   : > { %v867_v48 = vadd.f32 %v1842_v44, %v845_v47 }
 0x1c6   : > { %876 = vst.msk [vmem:[%s2960_s12 + $0x8] sm:$0xff] %vm874_vm2, %v867_v48 }
 0x1c7   : > { %v846_v49 = vpop.trf.xlu0 }
 0x1c8   : > { %v868_v50 = vadd.f32 %v1842_v44, %v846_v49 }
 0x1ca   : > { %877 = vst.msk [vmem:[%s2960_s12 + $0x10] sm:$0xff] %vm874_vm2, %v868_v50 }
 0x1cb   : > { %v847_v51 = vpop.trf.xlu0 }
 0x1cc   : > { %v869_v52 = vadd.f32 %v1842_v44, %v847_v51 }
 0x1ce   : > { %878 = vst.msk [vmem:[%s2960_s12 + $0x18] sm:$0xff] %vm874_vm2, %v869_v52 }
 0x1cf   : > { %v848_v53 = vpop.trf.xlu0 }
 0x1d0   : > { %v870_v54 = vadd.f32 %v1842_v44, %v848_v53 }
 0x1d2   : > { %879 = vst.msk [vmem:[%s2960_s12 + $0x20] sm:$0xff] %vm874_vm2, %v870_v54 }
 0x1d3   : > { %v849_v55 = vpop.trf.xlu0 }
 0x1d4   : > { %v871_v56 = vadd.f32 %v1842_v44, %v849_v55 }
 0x1d6   : > { %880 = vst.msk [vmem:[%s2960_s12 + $0x28] sm:$0xff] %vm874_vm2, %v871_v56 }
 0x1d7   : > { %v850_v57 = vpop.trf.xlu0 }
 0x1d8   : > { %v872_v58 = vadd.f32 %v1842_v44, %v850_v57 }
 0x1da   : > { %881 = vst.msk [vmem:[%s2960_s12 + $0x30] sm:$0xff] %vm874_vm2, %v872_v58 }
 0x1db   : > { %v851_v59 = vpop.trf.xlu0 }
 0x1dc   : > { %v873_v60 = vadd.f32 %v1842_v44, %v851_v59 }
 0x1de   : > { %882 = vst.msk [vmem:[%s2960_s12 + $0x38] sm:$0xff] %vm874_vm2, %v873_v60 }
 0x1e7   : > { %v1475_v61 = vpop.trf.xlu1 }
 0x1e8   : > { %v1491_v62 = vadd.f32 %v1842_v44, %v1475_v61 }
 0x1ea   : > { %1847 = vst.msk [vmem:[%s2960_s12 + $0x40] sm:$0xff] %vm874_vm2, %v1491_v62 }
 0x1eb   : > { %v1476_v63 = vpop.trf.xlu1 }
 0x1ec   : > { %v1492_v1 = vadd.f32 %v1842_v44, %v1476_v63 }
 0x1ee   : > { %1848 = vst.msk [vmem:[%s2960_s12 + $0x48] sm:$0xff] %vm874_vm2, %v1492_v1 }
 0x1ef   : > { %v1477_v2 = vpop.trf.xlu1 }
 0x1f0   : > { %v1493_v3 = vadd.f32 %v1842_v44, %v1477_v2 }
 0x1f2   : > { %1849 = vst.msk [vmem:[%s2960_s12 + $0x50] sm:$0xff] %vm874_vm2, %v1493_v3 }
 0x1f3   : > { %v1478_v4 = vpop.trf.xlu1 }
 0x1f4   : > { %v1494_v5 = vadd.f32 %v1842_v44, %v1478_v4 }
 0x1f6   : > { %1850 = vst.msk [vmem:[%s2960_s12 + $0x58] sm:$0xff] %vm874_vm2, %v1494_v5 }
 0x1f7   : > { %v1479_v6 = vpop.trf.xlu1 }
 0x1f8   : > { %v1495_v7 = vadd.f32 %v1842_v44, %v1479_v6 }
 0x1fa   : > { %1851 = vst.msk [vmem:[%s2960_s12 + $0x60] sm:$0xff] %vm874_vm2, %v1495_v7 }
 0x1fb   : > { %v1480_v8 = vpop.trf.xlu1 }
 0x1fc   : > { %v1496_v9 = vadd.f32 %v1842_v44, %v1480_v8 }
 0x1fe   : > { %1852 = vst.msk [vmem:[%s2960_s12 + $0x68] sm:$0xff] %vm874_vm2, %v1496_v9 }
 0x1ff   : > { %v1481_v10 = vpop.trf.xlu1 }
 0x200   : > { %v1497_v11 = vadd.f32 %v1842_v44, %v1481_v10 }
 0x202   : > { %1853 = vst.msk [vmem:[%s2960_s12 + $0x70] sm:$0xff] %vm874_vm2, %v1497_v11  ;;  %1514 = sbr.rel (!%p3116_p5) target bundleno = 560 (0x230), region = 44 }
 0x203   : > { %v1482_v12 = vpop.trf.xlu1 }
 0x204   : > { %v1498_v13 = vadd.f32 %v1842_v44, %v1482_v12 }
 0x206   : > { %1854 = vst.msk [vmem:[%s2960_s12 + $0x78] sm:$0xff] %vm874_vm2, %v1498_v13 }
 0x207   : > { %s3130_s4 = smov (!%p1518_p12, %s1517_s4), 2 }
 0x208   : > { %s1880_s10 = sshll.u32 %s3130_s4, 10  ;;  %s1862_s11 = sshll.u32 %s3130_s4, 3 }
 0x209   : > { %p1863_p3 = scmp.eq.s32.totalorder %s1880_s10, 0 }
 0x20a   : > { %s3009_s26 = sshrl.u32 (!%p1863_p3), %s1862_s11, 4 }
 0x20b   : > { %1530 = sbr.rel (%p1863_p3) target bundleno = 560 (0x230), region = 48  ;;  %p1864_p0 = scmp.le.s32.totalorder (!%p1863_p3), %s3009_s26, 0 }
 0x210   : > { %1759 = sbr.rel (%p1864_p0) target bundleno = 543 (0x21f), region = 132  ;;  %s3117_s15 = smov (!%p1864_p0), %s3001_s9 }
 0x211   : > { %s3118_s18 = smov (!%p1864_p0), %s2960_s12  ;;  %s3018_s22 = smov (!%p1864_p0), 0  }
 0x212   : > { %s3020_s21 = smov (!%p1864_p0), 0  }
 0x215 LB: >> { %v1623_v14 = vld [vmem:[%s2449_s18] sm:$0xff]  ;;  %v1625_v15 = vld [vmem:[%s2449_s18 + $0x8] sm:$0xff]  ;;  %v1627_v16 = vld [vmem:[%s2449_s18 + $0x10] sm:$0xff]  ;;  %s1655_s28 = sadd.s32 1, %s2453_s22  ;;  %s1617_s21 = sadd.s32 1, %s2457_s21   ;;  %s2457_s21 = sphi %s3020_s21, %s1617_s21   ;;  %s2453_s22 = sphi %s3018_s22, %s3119_s22   ;;  %s2449_s18 = sphi %s3118_s18, %s1660_s18   ;;  %s2445_s15 = sphi %s3117_s15, %s1661_s15  }
 0x216   : >> { %1624 = vst [vmem:[%s2445_s15] sm:$0xff] %v1623_v14  ;;  %1626 = vst [vmem:[%s2445_s15 + $0x8] sm:$0xff] %v1625_v15  ;;  %v1629_v17 = vld [vmem:[%s2449_s18 + $0x18] sm:$0xff]  ;;  %v1631_v19 = vld [vmem:[%s2449_s18 + $0x20] sm:$0xff]  ;;  %p1656_p2 = scmp.ge.s32.totalorder %s1655_s28, %s3009_s26  ;;  %p1616_p4 = scmp.ge.s32.totalorder %s1617_s21, %s3009_s26 }
 0x217   : >> { %1628 = vst [vmem:[%s2445_s15 + $0x10] sm:$0xff] %v1627_v16  ;;  %v1633_v20 = vld [vmem:[%s2449_s18 + $0x28] sm:$0xff]  ;;  %1630 = vst [vmem:[%s2445_s15 + $0x18] sm:$0xff] %v1629_v17  ;;  %v1635_v21 = vld [vmem:[%s2449_s18 + $0x30] sm:$0xff] }
 0x218   : >> { %1632 = vst [vmem:[%s2445_s15 + $0x20] sm:$0xff] %v1631_v19  ;;  %1634 = vst [vmem:[%s2445_s15 + $0x28] sm:$0xff] %v1633_v20  ;;  %v1637_v18 = vld [vmem:[%s2449_s18 + $0x38] sm:$0xff]  ;;  %v1639_v22 = vld [vmem:[%s2449_s18 + $0x40] sm:$0xff]  ;;  %s3132_s28 = smov (%p1656_p2, %s1655_s28), 0 }
 0x219   : >> { %1636 = vst [vmem:[%s2445_s15 + $0x30] sm:$0xff] %v1635_v21  ;;  %1638 = vst [vmem:[%s2445_s15 + $0x38] sm:$0xff] %v1637_v18  ;;  %v1641_v23 = vld [vmem:[%s2449_s18 + $0x48] sm:$0xff]  ;;  %v1643_v0 = vld [vmem:[%s2449_s18 + $0x50] sm:$0xff]  ;;  %s1865_s29 = sshll.u32 %s3132_s28, 7  ;;  %s3119_s22 = smov %s3132_s28 }
 0x21a   : >> { %1640 = vst [vmem:[%s2445_s15 + $0x40] sm:$0xff] %v1639_v22  ;;  %v1645_v24 = vld [vmem:[%s2449_s18 + $0x58] sm:$0xff]  ;;  %1642 = vst [vmem:[%s2445_s15 + $0x48] sm:$0xff] %v1641_v23  ;;  %v1647_v25 = vld [vmem:[%s2449_s18 + $0x60] sm:$0xff]  ;;  %1619 = sbr.rel (!%p1616_p4) target bundleno = 533 (0x215), region = 138 }
 0x21b   : >> { %1644 = vst [vmem:[%s2445_s15 + $0x50] sm:$0xff] %v1643_v0  ;;  %1646 = vst [vmem:[%s2445_s15 + $0x58] sm:$0xff] %v1645_v24  ;;  %v1649_v26 = vld [vmem:[%s2449_s18 + $0x68] sm:$0xff]  ;;  %v1651_v27 = vld [vmem:[%s2449_s18 + $0x70] sm:$0xff] }
 0x21c   : >> { %1648 = vst [vmem:[%s2445_s15 + $0x60] sm:$0xff] %v1647_v25  ;;  %1650 = vst [vmem:[%s2445_s15 + $0x68] sm:$0xff] %v1649_v26  ;;  %v1653_v28 = vld [vmem:[%s2449_s18 + $0x78] sm:$0xff]  ;;  %s1660_s18 = scalar_lea.vmem %s2960_s12, %s1865_s29 [#allocation6]  }
 0x21d   : >> { %1652 = vst [vmem:[%s2445_s15 + $0x70] sm:$0xff] %v1651_v27  ;;  %1654 = vst [vmem:[%s2445_s15 + $0x78] sm:$0xff] %v1653_v28  ;;  %s1661_s15 = scalar_lea.vmem %s3001_s9, %s1865_s29  }
 0x21f PF: > { %s3079_s5 = sand.u32 15, %s1862_s11   ;;  %s1883_s6 = sshll.u32 %s3009_s26, 7 }
 0x220   : > { %s1666_s23 = scalar_lea.vmem %s2960_s12, %s1883_s6 [#allocation6]   ;;  %s1668_s24 = scalar_lea.vmem %s3001_s9, %s1883_s6  }
 0x221   : > { %p1870_p1 = scmp.le.s32.totalorder %s3079_s5, 0 }
 0x222   : > { %s2459_s27 = smov (!%p1870_p1), %s1668_s24   ;;  %s2463_s20 = smov (!%p1870_p1), %s1666_s23  }
 0x223   : > { %1773 = sbr.rel (%p1870_p1) target bundleno = 560 (0x230), region = 143  ;;  %s2467_s30 = smov (!%p1870_p1), 0  }
 0x224   : > { %s2471_s7 = smov (!%p1870_p1), 0  }
 0x228 LB: >> { %v1678_v29 = vld [vmem:[%s2465_s20] sm:$0xff]  ;;  %s1680_s4 = sadd.s32 1, %s2469_s30  ;;  %s1672_s7 = sadd.s32 1, %s2473_s7   ;;  %s2473_s7 = sphi %s2471_s7, %s1672_s7   ;;  %s2469_s30 = sphi %s2467_s30, %s2468_s30   ;;  %s2465_s20 = sphi %s2463_s20, %s1685_s20   ;;  %s2461_s27 = sphi %s2459_s27, %s1686_s27  }
 0x229   : >> { %1679 = vst [vmem:[%s2461_s27] sm:$0xff] %v1678_v29  ;;  %p1681_p6 = scmp.ge.s32.totalorder %s1680_s4, %s3079_s5  ;;  %p1671_p7 = scmp.ge.s32.totalorder %s1672_s7, %s3079_s5 }
 0x22b   : >> { %s3134_s4 = smov (%p1681_p6, %s1680_s4), 0  ;;  %1674 = sbr.rel (!%p1671_p7) target bundleno = 552 (0x228), region = 149 }
 0x22c   : >> { %s1871_s12 = sshll.u32 %s3134_s4, 3  ;;  %s2468_s30 = smov %s3134_s4  }
 0x22d   : >> { %s1685_s20 = scalar_lea.vmem %s1666_s23, %s1871_s12 [#allocation6]   ;;  %s1686_s27 = scalar_lea.vmem %s1668_s24, %s1871_s12  }
 0x230 PF: > { %s17_s17 = sadd.s32 1, %s2441_s17   ;;  %s3120_s12 = smov %s2425_s13 }
 0x231   : > { %p14_p9 = scmp.ge.s32.totalorder %s17_s17, 4   ;;  %s3121_s13 = smov %s2429_s14 }
 0x232   : > { %s3122_s14 = smov %s2558_s25  ;;  %s3123_s15 = smov %s2437_s16 }
 0x233   : > { %s3124_s16 = smov %s3126_s19  ;;  %16 = sbr.rel (!%p14_p9) target bundleno = 5 (0x5), region = 160 }
 0x238   :  { %1702 = vsyncpa [#allocation3], 1 }
 0x239   :  { %1704 = vsyncpa [#allocation3 + $0x1], 1 }
 0x23a   :  { %1705 = vsyncpa [#allocation5], 1 }

</bundles_post_ra>
